<compile_context>
chip_gen: v7x
topology: tpu7x:2x2x1
jax: 0.10.0
libtpu: 0.0.40
codegen_flags: <defaults>
</compile_context>

<pallas_src>
import jax
import jax.numpy as jnp
from jax.experimental import pallas as pl
from jax.experimental.pallas import tpu as pltpu

LAMBDA_REG = 0.5
D = 2
GD_STEPS = 5


def _reg_loss_kernel(q_ref, out_ref):
    # q_ref: (d, d) f32 in VMEM (full-array block, Mosaic masks the padded
    # lanes/sublanes of the vreg, so the reduction only sees the d*d elements).
    q = q_ref[...]
    l1 = jnp.sum(jnp.abs(q - 1.0) + jnp.abs(q + 1.0))
    out_ref[0, 0] = l1 * LAMBDA_REG


def discrete_regularization_loss(Q):
    """Q: (d, d) array. Returns scalar f32 = lambda_reg * (sum|Q-1| + sum|Q+1|)."""
    Q = Q.astype(jnp.float32)
    d0, d1 = Q.shape
    out = pl.pallas_call(
        _reg_loss_kernel,
        out_shape=jax.ShapeDtypeStruct((1, 1), jnp.float32),
        in_specs=[pl.BlockSpec(memory_space=pltpu.MemorySpace.VMEM)],
        out_specs=pl.BlockSpec(memory_space=pltpu.MemorySpace.SMEM),
        cost_estimate=pl.CostEstimate(
            flops=6 * d0 * d1,            # sub/abs/add/abs/add + sum + scale
            transcendentals=0,
            bytes_accessed=d0 * d1 * 4 + 4,
        ),
    )(Q)
    return out[0, 0]


def init_glase_params(key, d, gd_steps):
    """Deterministic synthetic init of gLASE GD-step params.

    Each gd step holds a Q parameter of shape (1, d, d) (the module accesses
    model.gd[0].Q[0], i.e. the leading axis is squeezed).
    """
    keys = jax.random.split(key, gd_steps)
    return [jax.random.normal(k, (1, d, d), dtype=jnp.float32) for k in keys]


if __name__ == "__main__":
    key = jax.random.PRNGKey(0)
    gd_Q_params = init_glase_params(key, D, GD_STEPS)

    # forward(): uses model.gd[0].Q[0] -> (d, d)
    Q0 = gd_Q_params[0][0]

    loss = discrete_regularization_loss(Q0)
    loss = jax.block_until_ready(loss)

    # Reference check in plain JAX (same semantics as the torch forward).
    ref = (jnp.sum(jnp.abs(Q0 - 1.0)) + jnp.sum(jnp.abs(Q0 + 1.0))) * LAMBDA_REG
    assert jnp.allclose(loss, ref, rtol=1e-6, atol=1e-6), (loss, ref)

    print("KERNEL_OK")
</pallas_src>

<mosaic_0001>
module attributes {stable_mosaic.version = 11 : i64} {
  func.func @_reg_loss_kernel(%arg0: memref<2x2xf32, #tpu.memory_space<vmem>>, %arg1: memref<1x1xf32, #tpu.memory_space<smem>>) attributes {dimension_semantics = [], scalar_prefetch = 0 : i64, scratch_operands = 0 : i64, tpu.core_type = #tpu.core_type<tc>} {
    %c0 = arith.constant 0 : index
    %c0_0 = arith.constant 0 : index
    %0 = vector.load %arg0[%c0, %c0_0] : memref<2x2xf32, #tpu.memory_space<vmem>>, vector<2x2xf32>
    %cst = arith.constant 1.000000e+00 : f32
    %1 = vector.broadcast %cst : f32 to vector<2x2xf32>
    %2 = arith.subf %0, %1 : vector<2x2xf32>
    %3 = math.absf %2 : vector<2x2xf32>
    %cst_1 = arith.constant 1.000000e+00 : f32
    %4 = vector.broadcast %cst_1 : f32 to vector<2x2xf32>
    %5 = arith.addf %0, %4 : vector<2x2xf32>
    %6 = math.absf %5 : vector<2x2xf32>
    %7 = arith.addf %3, %6 : vector<2x2xf32>
    %8 = vector.shape_cast %7 : vector<2x2xf32> to vector<1x2x2xf32>
    %cst_2 = arith.constant dense<0.000000e+00> : vector<1xf32>
    %9 = vector.multi_reduction <add>, %8, %cst_2 [1, 2] : vector<1x2x2xf32> to vector<1xf32>
    %10 = vector.shape_cast %9 : vector<1xf32> to vector<1x1x1xf32>
    %11 = vector.extract %10[0, 0, 0] : f32 from vector<1x1x1xf32>
    %cst_3 = arith.constant 5.000000e-01 : f32
    %12 = arith.mulf %11, %cst_3 : f32
    %c0_4 = arith.constant 0 : index
    %c0_5 = arith.constant 0 : index
    %13 = memref.load %arg1[%c0_4, %c0_5] : memref<1x1xf32, #tpu.memory_space<smem>>
    memref.store %12, %arg1[%c0_4, %c0_5] : memref<1x1xf32, #tpu.memory_space<smem>>
    return
  }
}

</mosaic_0001>

<bundles_post_ra>
// kernel: tpu_custom_call.1
= control target key start
LH: loop header
LB: loop body
LE: loop exit
PB: predicated region body
PF: predicated region fallthrough
CT: control target
= control target key end

     0   :  { %6 = vsyncpa [#allocation3], 0  ;;  %s132_s0 = inlined_call_operand.hbm [shape: f32[2,2], index: 0, kind: input, shape index: {}]   ;;  %s133_s1 = inlined_call_operand.hbm [shape: f32[1,1], index: 1, kind: output, shape index: {}]  }
   0x1   :  { %7 = vsyncpa [#allocation4], 0  ;;  %s96_s6 = smov [#allocation2]   ;;  %s60_s10 = scalar_lea.hbm %s132_s0, 32 }
   0x2   :  { %s14_s7 = sshll.u32 %s96_s6, 4  ;;  %p61_p0 = scmp.ne.s32.totalorder %s132_s0, %s60_s10  ;;  %s15_s7 = int_to_ptr.vmem [resolvable:$true] %s14_s7 }
   0x3   :  { %p64_p1 = scmp.lt.u32.totalorder %s60_s10, %s132_s0 }
   0x5   :  { %p66_p2 = pnand %p64_p1, %p61_p0 }
   0x7   :  { %69 = shalt.err (!%p66_p2)
}
   0x8   :  { %s70_s15 = scalar_lea.vmem %s15_s7, 32  ;;  %p75_p4 = scmp.lt.s32.totalorder %s15_s7, %s15_s7 }
   0x9   :  { %p71_p3 = scmp.ne.s32.totalorder %s15_s7, %s70_s15  ;;  %p76_p5 = scmp.lt.s32.totalorder %s70_s15, %s70_s15 }
   0xb   :  { %p77_p6 = por %p76_p5, %p75_p4 }
   0xd   :  { %p78_p7 = pnand %p77_p6, %p71_p3 }
   0xf   :  { %81 = shalt.err (!%p78_p7)
}
  0x10   :  { %17 = dma.hbm_to_vmem [thread:$0]  %s132_s0, 32, %s15_s7, [#allocation3]  }
  0x11   :  { %92 = dma.done.wait [#allocation3], 32  }
  0x12   :  { %93 = vsyncadd [#allocation3], 4294967264  ;;  %v21_v0 = vld [vmem:[#allocation2] sm:$0x3]  ;;  %vm27_vm0 = vcmask 9216   ;;  %s82_s21 = scalar_lea.hbm %s133_s1, 16 }
  0x13   :  { %v55_v1 = vadd.f32 -1.0, %v21_v0  ;;  %v24_v2 = vadd.f32 1.0, %v21_v0  ;;  %p83_p8 = scmp.ne.s32.totalorder %s133_s1, %s82_s21  ;;  %p86_p9 = scmp.lt.u32.totalorder %s82_s21, %s133_s1 }
  0x15   :  { %v23_v3 = vand.u32 2147483647, %v55_v1  ;;  %v25_v4 = vand.u32 2147483647, %v24_v2  ;;  %p88_p10 = pnand %p86_p9, %p83_p8 }
  0x17   :  { %v26_v5 = vadd.f32 %v25_v4, %v23_v3 }
  0x19   :  { %v28_v6 = vsel %vm27_vm0, %v26_v5, 0.0 }
  0x1a   :  { %29 = vadd.xlane.f32.xlu0 %v28_v6 }
  0xa7   :  { %v30_v7 = vpop.xlane.xlu0 %29 }
  0xa8   :  { %v31_v8 = vrot.slane %v30_v7, 4 }
  0xaa   :  { %v32_v9 = vadd.f32 %v31_v8, %v30_v7 }
  0xac   :  { %v33_v10 = vrot.slane %v32_v9, 2 }
  0xae   :  { %v34_v11 = vadd.f32 %v33_v10, %v32_v9 }
  0xb0   :  { %v35_v12 = vrot.slane %v34_v11, 1 }
  0xb2   :  { %v36_v13 = vadd.f32 %v35_v12, %v34_v11 }
  0xb4   :  { %56 = vpush %v36_v13 }
  0xe5   :  { %s57_s0 = spop %56 }
  0xe6   :  { %s38_s18 = smul.f32 0.5, %s57_s0 }
  0xe8   :  { %40 = sst [smem:[#allocation5]] %s38_s18 }
  0xe9   :  { %91 = shalt.err (!%p88_p10)
}
  0xea   :  { %s97_s26 = smov [#allocation5]  }
  0xeb   :  { %48 = dma.smem_to_hbm %s97_s26, 16, %s133_s1, [#allocation4]  }
  0xec   :  { %94 = dma.done.wait [#allocation4], 16  }
  0xed   :  { %95 = vsyncadd [#allocation4], 4294967280 }
  0xee   :  { %52 = sfence }
  0xef   :  { %53 = vsyncpa [#allocation3], 1 }
  0xf0   :  { %54 = vsyncpa [#allocation4], 1 }

</bundles_post_ra>
